<compile_context>
chip_gen: v5e
topology: v5e:2x2
jax: 0.10.0
libtpu: 0.0.40
codegen_flags: <defaults>
</compile_context>

<pallas_src>
import jax
import jax.numpy as jnp
import numpy as np
from jax.experimental import pallas as pl
from jax.experimental.pallas import tpu as pltpu


def _sigmoid_eup(z):
    # exp -> EUP slot, approx reciprocal -> EUP slot (keeps the gate off the VALU divide)
    return pl.reciprocal(1.0 + jnp.exp(-z), approx=True)


def _highway_kernel(x_ref, w_ref, b_ref, out_ref):
    # x_ref  : (G, dim, S)      grouped batch block, channels-first (sublane=dim, lane=S)
    # w_ref  : (L, 2*dim, dim)  per-layer fused [gate; linear] weights
    # b_ref  : (L, 2*dim, 1)    per-layer fused biases
    # out_ref: (G, dim, S)
    G = x_ref.shape[0]
    L = w_ref.shape[0]
    dim = x_ref.shape[1]
    mm_dtype = w_ref.dtype  # f32, or bf16 for MXU-friendly operands (acc stays f32)

    for g in range(G):                     # small static unroll over grouped batch elems
        x = x_ref[g].astype(jnp.float32)   # (dim, S)
        for i in range(L):                 # highway layers (static)
            # fused gate+linear projection: one MXU push, M=2*dim, K=dim, N(lanes)=S
            h = jnp.dot(w_ref[i], x.astype(mm_dtype),
                        preferred_element_type=jnp.float32) + b_ref[i]   # (2*dim, S)
            gate = _sigmoid_eup(h[:dim, :])
            nonlinear = h[dim:, :]
            # TODO(synk): F.dropout(nonlinear, p=0.1) is identity in eval mode;
            # training-mode dropout would need pltpu.prng_random_bits.
            x = x + gate * (nonlinear - x)  # == gate*nl + (1-gate)*x, fewer VALU ops
        out_ref[g] = x.astype(out_ref.dtype)


def highway_forward(x, w_gate, b_gate, w_linear, b_linear,
                    *, group_size=None, mxu_dtype=jnp.float32):
    """
    x        : (B, dim, S)   same layout as the PyTorch module (Conv1d channels-first)
    w_gate   : (L, dim, dim) PyTorch Conv1d weights with the kernel dim squeezed
    w_linear : (L, dim, dim)
    b_gate   : (L, dim)
    b_linear : (L, dim)
    returns  : (B, dim, S)
    """
    B, dim, S = x.shape
    L = w_gate.shape[0]
    assert L >= 1

    # Fuse gate + linear into one (2*dim, dim) weight per layer -> 1 matmul / layer.
    w_fused = jnp.concatenate([w_gate, w_linear], axis=1).astype(mxu_dtype)          # (L, 2*dim, dim)
    b_fused = jnp.concatenate([b_gate, b_linear], axis=1)[..., None].astype(jnp.float32)  # (L, 2*dim, 1)

    if group_size is None:
        group_size = 2 if (B % 2 == 0 and B > 1) else 1
    assert B % group_size == 0, (B, group_size)
    grid = (B // group_size,)

    grid_spec = pltpu.PrefetchScalarGridSpec(
        num_scalar_prefetch=0,
        grid=grid,
        in_specs=[
            pl.BlockSpec((group_size, dim, S), lambda b: (b, 0, 0)),   # x block
            pl.BlockSpec((L, 2 * dim, dim), lambda b: (0, 0, 0)),      # fused weights (resident)
            pl.BlockSpec((L, 2 * dim, 1), lambda b: (0, 0, 0)),        # fused biases (resident)
        ],
        out_specs=pl.BlockSpec((group_size, dim, S), lambda b: (b, 0, 0)),
    )

    return pl.pallas_call(
        _highway_kernel,
        out_shape=jax.ShapeDtypeStruct((B, dim, S), jnp.float32),
        grid_spec=grid_spec,
        compiler_params=pltpu.CompilerParams(dimension_semantics=("parallel",)),
    )(x, w_fused, b_fused)


def init_params(key, layer_num, dim):
    """Matches the PyTorch shapes: Conv1d(dim, dim, 1) weight (out,in,1)->(out,in), bias (out,)."""
    ks = jax.random.split(key, 4)
    bound = 1.0 / np.sqrt(float(dim))
    w_gate = jax.random.uniform(ks[0], (layer_num, dim, dim), jnp.float32, -bound, bound)
    w_linear = jax.random.uniform(ks[1], (layer_num, dim, dim), jnp.float32, -bound, bound)
    b_gate = jax.random.uniform(ks[2], (layer_num, dim), jnp.float32, -bound, bound)
    b_linear = jax.random.uniform(ks[3], (layer_num, dim), jnp.float32, -bound, bound)
    return w_gate, b_gate, w_linear, b_linear


def reference_forward(x, w_gate, b_gate, w_linear, b_linear):
    """Pure-JAX reference matching the PyTorch Highway.forward (eval mode)."""
    hp = jax.lax.Precision.HIGHEST
    L = w_gate.shape[0]
    for i in range(L):
        gate = jax.nn.sigmoid(
            jnp.einsum("oi,bis->bos", w_gate[i], x, precision=hp) + b_gate[i][None, :, None])
        nonlinear = (jnp.einsum("oi,bis->bos", w_linear[i], x, precision=hp)
                     + b_linear[i][None, :, None])
        x = gate * nonlinear + (1.0 - gate) * x
    return x


if __name__ == "__main__":
    B, dim, S, L = 4, 64, 128, 2   # batch, channels, seq_len, highway layers

    key = jax.random.PRNGKey(0)
    kx, kp = jax.random.split(key)
    x = jax.random.normal(kx, (B, dim, S), jnp.float32)
    w_gate, b_gate, w_linear, b_linear = init_params(kp, L, dim)

    out = highway_forward(x, w_gate, b_gate, w_linear, b_linear)
    out = jax.block_until_ready(out)
    assert out.shape == (B, dim, S), out.shape

    ref = reference_forward(x, w_gate, b_gate, w_linear, b_linear)
    np.testing.assert_allclose(np.asarray(out), np.asarray(ref), rtol=2e-2, atol=2e-2)
    print("KERNEL_OK")
</pallas_src>

<mosaic_0001>
module attributes {stable_mosaic.version = 11 : i64} {
  func.func @_highway_kernel(%arg0: i32, %arg1: memref<2x64x128xf32, #tpu.memory_space<vmem>>, %arg2: memref<2x128x64xf32, #tpu.memory_space<vmem>>, %arg3: memref<2x128x1xf32, #tpu.memory_space<vmem>>, %arg4: memref<2x64x128xf32, #tpu.memory_space<vmem>>) attributes {dimension_semantics = [#tpu.dimension_semantics<parallel>], iteration_bounds = array<i64: 2>, scalar_prefetch = 0 : i64, scratch_operands = 0 : i64, tpu.core_type = #tpu.core_type<tc>, window_params = [{transform_indices = @transform_0, window_bounds = array<i64: 2, 64, 128>}, {pipeline_mode = #tpu.pipeline_mode<synchronous>, transform_indices = @transform_1, window_bounds = array<i64: 2, 128, 64>}, {pipeline_mode = #tpu.pipeline_mode<synchronous>, transform_indices = @transform_2, window_bounds = array<i64: 2, 128, 1>}, {transform_indices = @transform_3, window_bounds = array<i64: 2, 64, 128>}]} {
    %c0 = arith.constant 0 : index
    %c0_0 = arith.constant 0 : index
    %c0_1 = arith.constant 0 : index
    %0 = vector.load %arg1[%c0, %c0_0, %c0_1] : memref<2x64x128xf32, #tpu.memory_space<vmem>>, vector<1x64x128xf32>
    %1 = vector.shape_cast %0 : vector<1x64x128xf32> to vector<64x128xf32>
    %c0_2 = arith.constant 0 : index
    %c0_3 = arith.constant 0 : index
    %c0_4 = arith.constant 0 : index
    %2 = vector.load %arg2[%c0_2, %c0_3, %c0_4] : memref<2x128x64xf32, #tpu.memory_space<vmem>>, vector<1x128x64xf32>
    %3 = vector.shape_cast %2 : vector<1x128x64xf32> to vector<128x64xf32>
    %cst = arith.constant dense<0.000000e+00> : vector<128x128xf32>
    %4 = tpu.matmul %3, %1, %cst {dimension_numbers = #tpu.dot_dimension_numbers<[1], [0], [0], [1], [0, 0, 1, 1], [], []>} : vector<128x64xf32>, vector<64x128xf32>, vector<128x128xf32> -> vector<128x128xf32>
    %c0_5 = arith.constant 0 : index
    %c0_6 = arith.constant 0 : index
    %c0_7 = arith.constant 0 : index
    %5 = vector.load %arg3[%c0_5, %c0_6, %c0_7] : memref<2x128x1xf32, #tpu.memory_space<vmem>>, vector<1x128x1xf32>
    %6 = vector.shape_cast %5 : vector<1x128x1xf32> to vector<128x1xf32>
    %7 = vector.broadcast %6 : vector<128x1xf32> to vector<128x128xf32>
    %8 = arith.addf %4, %7 : vector<128x128xf32>
    %9 = vector.extract_strided_slice %8 {offsets = [0, 0], sizes = [64, 128], strides = [1, 1]} : vector<128x128xf32> to vector<64x128xf32>
    %cst_8 = arith.constant 0.000000e+00 : f32
    %10 = vector.broadcast %cst_8 : f32 to vector<64x128xf32>
    %11 = arith.subf %10, %9 : vector<64x128xf32>
    %12 = math.exp %11 : vector<64x128xf32>
    %cst_9 = arith.constant 1.000000e+00 : f32
    %13 = vector.broadcast %cst_9 : f32 to vector<64x128xf32>
    %14 = arith.addf %13, %12 : vector<64x128xf32>
    %15 = tpu.reciprocal %14 {approx = true} : vector<64x128xf32> -> vector<64x128xf32>
    %16 = vector.extract_strided_slice %8 {offsets = [64, 0], sizes = [64, 128], strides = [1, 1]} : vector<128x128xf32> to vector<64x128xf32>
    %17 = arith.subf %16, %1 : vector<64x128xf32>
    %18 = arith.mulf %15, %17 : vector<64x128xf32>
    %19 = arith.addf %1, %18 : vector<64x128xf32>
    %c1 = arith.constant 1 : index
    %c0_10 = arith.constant 0 : index
    %c0_11 = arith.constant 0 : index
    %20 = vector.load %arg2[%c1, %c0_10, %c0_11] : memref<2x128x64xf32, #tpu.memory_space<vmem>>, vector<1x128x64xf32>
    %21 = vector.shape_cast %20 : vector<1x128x64xf32> to vector<128x64xf32>
    %cst_12 = arith.constant dense<0.000000e+00> : vector<128x128xf32>
    %22 = tpu.matmul %21, %19, %cst_12 {dimension_numbers = #tpu.dot_dimension_numbers<[1], [0], [0], [1], [0, 0, 1, 1], [], []>} : vector<128x64xf32>, vector<64x128xf32>, vector<128x128xf32> -> vector<128x128xf32>
    %c1_13 = arith.constant 1 : index
    %c0_14 = arith.constant 0 : index
    %c0_15 = arith.constant 0 : index
    %23 = vector.load %arg3[%c1_13, %c0_14, %c0_15] : memref<2x128x1xf32, #tpu.memory_space<vmem>>, vector<1x128x1xf32>
    %24 = vector.shape_cast %23 : vector<1x128x1xf32> to vector<128x1xf32>
    %25 = vector.broadcast %24 : vector<128x1xf32> to vector<128x128xf32>
    %26 = arith.addf %22, %25 : vector<128x128xf32>
    %27 = vector.extract_strided_slice %26 {offsets = [0, 0], sizes = [64, 128], strides = [1, 1]} : vector<128x128xf32> to vector<64x128xf32>
    %cst_16 = arith.constant 0.000000e+00 : f32
    %28 = vector.broadcast %cst_16 : f32 to vector<64x128xf32>
    %29 = arith.subf %28, %27 : vector<64x128xf32>
    %30 = math.exp %29 : vector<64x128xf32>
    %cst_17 = arith.constant 1.000000e+00 : f32
    %31 = vector.broadcast %cst_17 : f32 to vector<64x128xf32>
    %32 = arith.addf %31, %30 : vector<64x128xf32>
    %33 = tpu.reciprocal %32 {approx = true} : vector<64x128xf32> -> vector<64x128xf32>
    %34 = vector.extract_strided_slice %26 {offsets = [64, 0], sizes = [64, 128], strides = [1, 1]} : vector<128x128xf32> to vector<64x128xf32>
    %35 = arith.subf %34, %19 : vector<64x128xf32>
    %36 = arith.mulf %33, %35 : vector<64x128xf32>
    %37 = arith.addf %19, %36 : vector<64x128xf32>
    %c0_18 = arith.constant 0 : index
    %c0_19 = arith.constant 0 : index
    %c0_20 = arith.constant 0 : index
    %38 = vector.load %arg4[%c0_18, %c0_19, %c0_20] : memref<2x64x128xf32, #tpu.memory_space<vmem>>, vector<1x64x128xf32>
    %39 = vector.shape_cast %38 : vector<1x64x128xf32> to vector<64x128xf32>
    %40 = vector.shape_cast %37 : vector<64x128xf32> to vector<1x64x128xf32>
    tpu.vector_store %arg4[%c0_18, %c0_19, %c0_20], %40 {strides = array<i32>} : memref<2x64x128xf32, #tpu.memory_space<vmem>>, vector<1x64x128xf32>,
    %c1_21 = arith.constant 1 : index
    %c0_22 = arith.constant 0 : index
    %c0_23 = arith.constant 0 : index
    %41 = vector.load %arg1[%c1_21, %c0_22, %c0_23] : memref<2x64x128xf32, #tpu.memory_space<vmem>>, vector<1x64x128xf32>
    %42 = vector.shape_cast %41 : vector<1x64x128xf32> to vector<64x128xf32>
    %c0_24 = arith.constant 0 : index
    %c0_25 = arith.constant 0 : index
    %c0_26 = arith.constant 0 : index
    %43 = vector.load %arg2[%c0_24, %c0_25, %c0_26] : memref<2x128x64xf32, #tpu.memory_space<vmem>>, vector<1x128x64xf32>
    %44 = vector.shape_cast %43 : vector<1x128x64xf32> to vector<128x64xf32>
    %cst_27 = arith.constant dense<0.000000e+00> : vector<128x128xf32>
    %45 = tpu.matmul %44, %42, %cst_27 {dimension_numbers = #tpu.dot_dimension_numbers<[1], [0], [0], [1], [0, 0, 1, 1], [], []>} : vector<128x64xf32>, vector<64x128xf32>, vector<128x128xf32> -> vector<128x128xf32>
    %c0_28 = arith.constant 0 : index
    %c0_29 = arith.constant 0 : index
    %c0_30 = arith.constant 0 : index
    %46 = vector.load %arg3[%c0_28, %c0_29, %c0_30] : memref<2x128x1xf32, #tpu.memory_space<vmem>>, vector<1x128x1xf32>
    %47 = vector.shape_cast %46 : vector<1x128x1xf32> to vector<128x1xf32>
    %48 = vector.broadcast %47 : vector<128x1xf32> to vector<128x128xf32>
    %49 = arith.addf %45, %48 : vector<128x128xf32>
    %50 = vector.extract_strided_slice %49 {offsets = [0, 0], sizes = [64, 128], strides = [1, 1]} : vector<128x128xf32> to vector<64x128xf32>
    %cst_31 = arith.constant 0.000000e+00 : f32
    %51 = vector.broadcast %cst_31 : f32 to vector<64x128xf32>
    %52 = arith.subf %51, %50 : vector<64x128xf32>
    %53 = math.exp %52 : vector<64x128xf32>
    %cst_32 = arith.constant 1.000000e+00 : f32
    %54 = vector.broadcast %cst_32 : f32 to vector<64x128xf32>
    %55 = arith.addf %54, %53 : vector<64x128xf32>
    %56 = tpu.reciprocal %55 {approx = true} : vector<64x128xf32> -> vector<64x128xf32>
    %57 = vector.extract_strided_slice %49 {offsets = [64, 0], sizes = [64, 128], strides = [1, 1]} : vector<128x128xf32> to vector<64x128xf32>
    %58 = arith.subf %57, %42 : vector<64x128xf32>
    %59 = arith.mulf %56, %58 : vector<64x128xf32>
    %60 = arith.addf %42, %59 : vector<64x128xf32>
    %c1_33 = arith.constant 1 : index
    %c0_34 = arith.constant 0 : index
    %c0_35 = arith.constant 0 : index
    %61 = vector.load %arg2[%c1_33, %c0_34, %c0_35] : memref<2x128x64xf32, #tpu.memory_space<vmem>>, vector<1x128x64xf32>
    %62 = vector.shape_cast %61 : vector<1x128x64xf32> to vector<128x64xf32>
    %cst_36 = arith.constant dense<0.000000e+00> : vector<128x128xf32>
    %63 = tpu.matmul %62, %60, %cst_36 {dimension_numbers = #tpu.dot_dimension_numbers<[1], [0], [0], [1], [0, 0, 1, 1], [], []>} : vector<128x64xf32>, vector<64x128xf32>, vector<128x128xf32> -> vector<128x128xf32>
    %c1_37 = arith.constant 1 : index
    %c0_38 = arith.constant 0 : index
    %c0_39 = arith.constant 0 : index
    %64 = vector.load %arg3[%c1_37, %c0_38, %c0_39] : memref<2x128x1xf32, #tpu.memory_space<vmem>>, vector<1x128x1xf32>
    %65 = vector.shape_cast %64 : vector<1x128x1xf32> to vector<128x1xf32>
    %66 = vector.broadcast %65 : vector<128x1xf32> to vector<128x128xf32>
    %67 = arith.addf %63, %66 : vector<128x128xf32>
    %68 = vector.extract_strided_slice %67 {offsets = [0, 0], sizes = [64, 128], strides = [1, 1]} : vector<128x128xf32> to vector<64x128xf32>
    %cst_40 = arith.constant 0.000000e+00 : f32
    %69 = vector.broadcast %cst_40 : f32 to vector<64x128xf32>
    %70 = arith.subf %69, %68 : vector<64x128xf32>
    %71 = math.exp %70 : vector<64x128xf32>
    %cst_41 = arith.constant 1.000000e+00 : f32
    %72 = vector.broadcast %cst_41 : f32 to vector<64x128xf32>
    %73 = arith.addf %72, %71 : vector<64x128xf32>
    %74 = tpu.reciprocal %73 {approx = true} : vector<64x128xf32> -> vector<64x128xf32>
    %75 = vector.extract_strided_slice %67 {offsets = [64, 0], sizes = [64, 128], strides = [1, 1]} : vector<128x128xf32> to vector<64x128xf32>
    %76 = arith.subf %75, %60 : vector<64x128xf32>
    %77 = arith.mulf %74, %76 : vector<64x128xf32>
    %78 = arith.addf %60, %77 : vector<64x128xf32>
    %c1_42 = arith.constant 1 : index
    %c0_43 = arith.constant 0 : index
    %c0_44 = arith.constant 0 : index
    %79 = vector.load %arg4[%c1_42, %c0_43, %c0_44] : memref<2x64x128xf32, #tpu.memory_space<vmem>>, vector<1x64x128xf32>
    %80 = vector.shape_cast %79 : vector<1x64x128xf32> to vector<64x128xf32>
    %81 = vector.shape_cast %78 : vector<64x128xf32> to vector<1x64x128xf32>
    tpu.vector_store %arg4[%c1_42, %c0_43, %c0_44], %81 {strides = array<i32>} : memref<2x64x128xf32, #tpu.memory_space<vmem>>, vector<1x64x128xf32>,
    return
  }
  func.func @transform_0(%arg0: i32) -> (i32, i32, i32) {
    %c0_i32 = arith.constant 0 : i32
    %c0_i32_0 = arith.constant 0 : i32
    %c0_i32_1 = arith.constant 0 : i32
    return %arg0, %c0_i32, %c0_i32_0 : i32, i32, i32
  }
  func.func @transform_1(%arg0: i32) -> (i32, i32, i32) {
    %c0_i32 = arith.constant 0 : i32
    %c0_i32_0 = arith.constant 0 : i32
    %c0_i32_1 = arith.constant 0 : i32
    %c0_i32_2 = arith.constant 0 : i32
    return %c0_i32, %c0_i32_0, %c0_i32_1 : i32, i32, i32
  }
  func.func @transform_2(%arg0: i32) -> (i32, i32, i32) {
    %c0_i32 = arith.constant 0 : i32
    %c0_i32_0 = arith.constant 0 : i32
    %c0_i32_1 = arith.constant 0 : i32
    %c0_i32_2 = arith.constant 0 : i32
    return %c0_i32, %c0_i32_0, %c0_i32_1 : i32, i32, i32
  }
  func.func @transform_3(%arg0: i32) -> (i32, i32, i32) {
    %c0_i32 = arith.constant 0 : i32
    %c0_i32_0 = arith.constant 0 : i32
    %c0_i32_1 = arith.constant 0 : i32
    return %arg0, %c0_i32, %c0_i32_0 : i32, i32, i32
  }
}

</mosaic_0001>

<bundles_post_ra>
// kernel: tpu_custom_call.1
= control target key start
LH: loop header
LB: loop body
LE: loop exit
PB: predicated region body
PF: predicated region fallthrough
CT: control target
= control target key end

     0   :  { %8 = vsyncpa [#allocation3], 0  ;;  %s2591_s0 = inlined_call_operand.vmem [shape: f32[4,64,128], index: 0, kind: input, shape index: {}]   ;;  %s2592_s1 = inlined_call_operand.vmem [shape: f32[2,128,64], index: 1, kind: input, shape index: {}]   ;;  %s2593_s2 = inlined_call_operand.vmem [shape: f32[2,128,1], index: 2, kind: input, shape index: {}]   ;;  %s2594_s3 = inlined_call_operand.hbm [shape: f32[4,64,128], index: 3, kind: output, shape index: {}]  }
   0x1   :  { %10 = vsyncpa [#allocation3 + $0x1], 0  ;;  %s1868_s12 = smov 0   ;;  %s1870_s13 = smov 0  }
   0x2   :  { %s1872_s14 = smov 0   ;;  %s1874_s15 = smov 0  }
   0x3 LB: > { %s1889_s16 = sadd.s32 4294967295, %s1843_s15   ;;  %s1447_s17 = sadd.s32 4294967294, %s1843_s15   ;;  %s1843_s15 = sphi %s1874_s15, %s2614_s15   ;;  %s1839_s14 = sphi %s1872_s14, %s2613_s14   ;;  %s1835_s13 = sphi %s1870_s13, %s2612_s13   ;;  %s1831_s12 = sphi %s1868_s12, %s2611_s12  }
   0x4   : > { %s1893_s18 = sadd.s32 1, %s1843_s15   ;;  %s91_s19 = sadd.s32 1, %s1839_s14 }
   0x5   : > { %s88_s20 = ssub.s32 %s1843_s15, %s1893_s18  ;;  %p101_p0 = scmp.ne.s32.totalorder %s1839_s14, %s1835_s13 }
   0x6   : > { %p89_p1 = scmp.eq.s32.totalorder %s88_s20, 0  ;;  %p102_p2 = scmp.eq.s32.totalorder %s1889_s16, 1 }
   0x7   : > { %p107_p3 = scmp.ne.s32.totalorder %s1835_s13, %s1831_s12  ;;  %p108_p4 = scmp.eq.s32.totalorder %s1447_s17, 1 }
   0x8   : > { %s1904_s21 = scalar_select %p89_p1, %s1839_s14, %s91_s19  }
   0x9   : > { %p1906_p5 = por %p102_p2, %p101_p0  ;;  %p1910_p6 = por %p108_p4, %p107_p3 }
   0xa   : > { %p1450_p7 = scmp.ge.s32.totalorder %s1843_s15, 1  ;;  %p142_p8 = scmp.lt.s32.totalorder %s1843_s15, 3 }
   0xc   : > { %p143_p9 = pnand %p1450_p7, %p142_p8 }
   0xe   : > { %146 = sbr.rel (%p143_p9) target bundleno = 583 (0x247), region = 32 }
  0x13   : > { %v203_v0 = vld [vmem:[%s2593_s2 + $0x20] sm:$0xff]  ;;  %v1922_v1 = vld [vmem:[%s2593_s2 + $0x10] sm:$0xff]  ;;  %s1452_s30 = sshll.u32 %s1889_s16, 1  ;;  %v1845_v3 = vmov 0   ;;  %v204_v4 = vld [vmem:[%s2593_s2 + $0x28] sm:$0xff]  ;;  %vm295_vm0 = vcmask 523264  }
  0x14   : > { %v1927_v2 = vld [vmem:[%s2593_s2] sm:$0xff]  ;;  %1652 = vset.pattern.permute.xlu2 %v1845_v3  ;;  %1651 = vset.pattern.permute.xlu1 %v1845_v3  ;;  %p168_p10 = scmp.lt.s32.totalorder %s1452_s30, 3  ;;  %v202_v8 = vld [vmem:[%s2593_s2 + $0x18] sm:$0xff]  ;;  %v200_v9 = vld [vmem:[%s2593_s2 + $0x8] sm:$0xff]  ;;  %s1801_s26 = scalar_lea.hbm %s2594_s3, 256 }
  0x15   : > { %1650 = vset.pattern.permute.xlu0 %v1845_v3  ;;  %237 = vperm.xlu2 %1652, %v203_v0   ;;  %v804_v17 = vld [vmem:[%s2593_s2 + $0x38] sm:$0xff]  ;;  %v205_v18 = vld [vmem:[%s2593_s2 + $0x30] sm:$0xff]  ;;  %v183_v25 = vld [vmem:[%s2592_s1] sm:$0xff] }
  0x16   : > { %227 = vperm.xlu1 %1651, %v1922_v1   ;;  %217 = vperm.xlu0 %1650, %v1927_v2   ;;  %s2616_s30 = smov (!%p168_p10, %s1452_s30), 3  ;;  %v184_v26 = vld [vmem:[%s2592_s1 + $0x8] sm:$0xff]  ;;  %v185_v27 = vld [vmem:[%s2592_s1 + $0x10] sm:$0xff]  ;;  %v812_v29 = vld [vmem:[%s2593_s2 + $0x78] sm:$0xff] }
  0x17   : > { %s1605_s4 = sshll.u32 %s2616_s30, 6  ;;  %v811_v28 = vld [vmem:[%s2593_s2 + $0x70] sm:$0xff]  ;;  %v186_v30 = vld [vmem:[%s2592_s1 + $0x18] sm:$0xff]  ;;  %v809_v31 = vld [vmem:[%s2593_s2 + $0x60] sm:$0xff] }
  0x18   : > { %s1935_s7 = scalar_lea.vmem %s2591_s0, %s1605_s4  ;;  %v810_v32 = vld [vmem:[%s2593_s2 + $0x68] sm:$0xff]  ;;  %v187_v33 = vld [vmem:[%s2592_s1 + $0x20] sm:$0xff]  ;;  %v808_v34 = vld [vmem:[%s2593_s2 + $0x58] sm:$0xff]  ;;  %s164_s4 = sand.u32 1, %s1835_s13  }
  0x19   : > { %v1941_v5 = vld [vmem:[%s1935_s7 + $0x38] sm:$0xff]  ;;  %v1947_v7 = vld [vmem:[%s1935_s7 + $0x30] sm:$0xff]  ;;  %v1961_v11 = vld [vmem:[%s1935_s7 + $0x28] sm:$0xff]  ;;  %s1451_s5 = sshll.u32 %s164_s4, 7 }
  0x1a   : > { %v1944_v6 = vld [vmem:[%s1935_s7 + $0x78] sm:$0xff]  ;;  %352 = vmatpush.msra.mxu0 %v1941_v5  ;;  %v1958_v10 = vld [vmem:[%s1935_s7 + $0x70] sm:$0xff]  ;;  %v1965_v12 = vld [vmem:[%s1935_s7 + $0x68] sm:$0xff]  ;;  %s2485_s6 = scalar_lea.vmem [#allocation2], %s1451_s5 }
  0x1b   : > { %949 = vmatpush.msra.mxu2 %v1944_v6  ;;  %v1968_v13 = vld [vmem:[%s1935_s7 + $0x20] sm:$0xff]  ;;  %v1976_v15 = vld [vmem:[%s1935_s7 + $0x18] sm:$0xff]  ;;  %v1992_v19 = vld [vmem:[%s1935_s7 + $0x10] sm:$0xff]  ;;  %s1382_s11 = sshll.u32 %s2485_s6, 4  ;;  %s1383_s11 = int_to_ptr.vmem [resolvable:$true] %s1382_s11 }
  0x1c   : > { %353 = vmatpush.msra.mxu0 %v1947_v7  ;;  %v1973_v14 = vld [vmem:[%s1935_s7 + $0x60] sm:$0xff]  ;;  %v1981_v16 = vld [vmem:[%s1935_s7 + $0x58] sm:$0xff]  ;;  %v1995_v20 = vld [vmem:[%s1935_s7 + $0x50] sm:$0xff] }
  0x1d   : > { %242 = vperm.xlu2 %1652, %v204_v4   ;;  %950 = vmatpush.msra.mxu2 %v1958_v10  ;;  %v1999_v21 = vld [vmem:[%s1935_s7 + $0x8] sm:$0xff]  ;;  %v2007_v23 = vld [vmem:[%s1935_s7] sm:$0xff]  ;;  %v807_v37 = vld [vmem:[%s2593_s2 + $0x50] sm:$0xff] }
  0x1e   : > { %232 = vperm.xlu1 %1651, %v202_v8   ;;  %222 = vperm.xlu0 %1650, %v200_v9   ;;  %v2002_v22 = vld [vmem:[%s1935_s7 + $0x48] sm:$0xff]  ;;  %2602 = vst [vmem:[#allocation6_spill] sm:$0xff] %v2007_v23  ;;  %v2010_v24 = vld [vmem:[%s1935_s7 + $0x40] sm:$0xff]  ;;  %v189_v38 = vld [vmem:[%s2592_s1 + $0x30] sm:$0xff]  ;;  %s1607_s7 = sshll.u32 %s1889_s16, 7  ;;  %s1369_s16 = scalar_lea.sflag [#allocation3], %s164_s4 }
  0x1f   : > { %354 = vmatpush.msra.mxu0 %v1961_v11  ;;  %951 = vmatpush.msra.mxu2 %v1965_v12  ;;  %2601 = vst [vmem:[#allocation5_spill] sm:$0xff] %v2002_v22  ;;  %v188_v35 = vld [vmem:[%s2592_s1 + $0x28] sm:$0xff]  ;;  %v805_v39 = vld [vmem:[%s2593_s2 + $0x40] sm:$0xff]  ;;  %v190_v40 = vld [vmem:[%s2592_s1 + $0x38] sm:$0xff]  ;;  %s1381_s10 = scalar_lea.hbm %s2594_s3, %s1607_s7 }
  0x20   : > { %2603 = vst [vmem:[#allocation7_spill] sm:$0xff] %v2010_v24  ;;  %v806_v36 = vld [vmem:[%s2593_s2 + $0x48] sm:$0xff]  ;;  %v1487_v41 = vld [vmem:[%s2593_s2 + $0x80] sm:$0xff]  ;;  %v1490_v43 = vld [vmem:[%s2593_s2 + $0x98] sm:$0xff]  ;;  %s1384_s17 = sshll.u32 %s1381_s10, 4  ;;  %s1385_s17 = int_to_ptr.hbm [resolvable:$true] %s1384_s17 }
  0x21   : > { %355 = vmatpush.msra.mxu0 %v1968_v13  ;;  %952 = vmatpush.msra.mxu2 %v1973_v14  ;;  %v191_v42 = vld [vmem:[%s2592_s1 + $0x40] sm:$0xff]  ;;  %v1489_v44 = vld [vmem:[%s2593_s2 + $0x90] sm:$0xff]  ;;  %v1488_v45 = vld [vmem:[%s2593_s2 + $0x88] sm:$0xff]  ;;  %s1795_s19 = sshra.s32 %s1385_s17, 4  ;;  %s1796_s19 = int_to_ptr.hbm [resolvable:$true] %s1795_s19 }
  0x22   : > { %v192_v46 = vld [vmem:[%s2592_s1 + $0x48] sm:$0xff]  ;;  %v1493_v47 = vld [vmem:[%s2593_s2 + $0xb0] sm:$0xff]  ;;  %v1491_v49 = vld [vmem:[%s2593_s2 + $0xa0] sm:$0xff]  ;;  %s1797_s20 = scalar_lea.hbm %s1796_s19, 128  ;;  %p1802_p0 = scmp.lt.s32.totalorder %s1796_s19, %s2594_s3 }
  0x23   : > { %356 = vmatpush.msra.mxu0 %v1976_v15  ;;  %953 = vmatpush.msra.mxu2 %v1981_v16  ;;  %v1492_v48 = vld [vmem:[%s2593_s2 + $0xa8] sm:$0xff]  ;;  %v193_v50 = vld [vmem:[%s2592_s1 + $0x50] sm:$0xff]  ;;  %v1495_v52 = vld [vmem:[%s2593_s2 + $0xc0] sm:$0xff]  ;;  %p1798_p11 = scmp.ne.s32.totalorder %s1796_s19, %s1797_s20  ;;  %p1803_p1 = scmp.lt.s32.totalorder %s1801_s26, %s1797_s20 }
  0x24   : > { %v1496_v51 = vld [vmem:[%s2593_s2 + $0xc8] sm:$0xff]  ;;  %v1494_v53 = vld [vmem:[%s2593_s2 + $0xb8] sm:$0xff]  ;;  %v1499_v55 = vld [vmem:[%s2593_s2 + $0xe0] sm:$0xff] }
  0x25   : > { %850 = vperm.xlu2 %1652, %v804_v17   ;;  %357 = vmatpush.msra.mxu0 %v1992_v19  ;;  %v194_v54 = vld [vmem:[%s2592_s1 + $0x58] sm:$0xff]  ;;  %v1497_v57 = vld [vmem:[%s2593_s2 + $0xd0] sm:$0xff]  ;;  %v195_v59 = vld [vmem:[%s2592_s1 + $0x60] sm:$0xff]  ;;  %p1799_p12 = pnand %p1798_p11, %p1906_p5  ;;  %p1804_p2 = por %p1803_p1, %p1802_p0 }
  0x26   : > { %252 = vperm.xlu1 %1651, %v804_v17   ;;  %247 = vperm.xlu0 %1650, %v205_v18   ;;  %v1498_v56 = vld [vmem:[%s2593_s2 + $0xd8] sm:$0xff]  ;;  %v1501_v61 = vld [vmem:[%s2593_s2 + $0xf0] sm:$0xff]  ;;  %v1500_v62 = vld [vmem:[%s2593_s2 + $0xe8] sm:$0xff] }
  0x27   : > { %954 = vmatpush.msra.mxu2 %v1995_v20  ;;  %358 = vmatpush.msra.mxu0 %v1999_v21  ;;  %v1502_v60 = vld [vmem:[%s2593_s2 + $0xf8] sm:$0xff]  ;;  %p1800_p13 = pneg %p1799_p12 }
  0x29   : > { %955 = vmatpush.msra.mxu2 %v2002_v22  ;;  %359 = vmatpush.msra.mxu0 %v2007_v23  ;;  %p1805_p3 = pnand %p1804_p2, %p1800_p13 }
  0x2a   : > { %1455 = vmatmul.msk.f32.vlgmr.msra.gmra.mxu0 %vm295_vm0, %v183_v25 }
  0x2b   : > { %956 = vmatpush.msra.mxu2 %v2010_v24 }
  0x2c   : > { %1527 = vmatmul.msk.f32.vlgmr.msra.gmra.mxu2 %vm295_vm0, %v183_v25 }
  0x2d   : > { %835 = vperm.xlu2 %1652, %v203_v0   ;;  %v196_v0 = vld [vmem:[%s2592_s1 + $0x68] sm:$0xff] }
  0x2e   : > { %840 = vperm.xlu1 %1651, %v204_v4   ;;  %845 = vperm.xlu0 %1650, %v205_v18   ;;  %v198_v4 = vld [vmem:[%s2592_s1 + $0x78] sm:$0xff] }
  0x32   : > { %1456 = vmatmul.msk.f32.gmra.mxu0 %vm295_vm0, %v184_v26 }
  0x34   : > { %1528 = vmatmul.msk.f32.gmra.mxu2 %vm295_vm0, %v184_v26 }
  0x35   : > { %820 = vperm.xlu2 %1652, %v200_v9  }
  0x36   : > { %825 = vperm.xlu1 %1651, %v1922_v1   ;;  %830 = vperm.xlu0 %1650, %v202_v8  }
  0x3a   : > { %1457 = vmatmul.msk.f32.gmra.mxu0 %vm295_vm0, %v185_v27 }
  0x3c   : > { %1529 = vmatmul.msk.f32.gmra.mxu2 %vm295_vm0, %v185_v27 }
  0x3d   : > { %885 = vperm.xlu2 %1652, %v811_v28  }
  0x3e   : > { %890 = vperm.xlu1 %1651, %v812_v29   ;;  %815 = vperm.xlu0 %1650, %v1927_v2   ;;  %v197_v2 = vld [vmem:[%s2592_s1 + $0x70] sm:$0xff] }
  0x42   : > { %1458 = vmatmul.msk.f32.gmra.mxu0 %vm295_vm0, %v186_v30 }
  0x44   : > { %1530 = vmatmul.msk.f32.gmra.mxu2 %vm295_vm0, %v186_v30 }
  0x45   : > { %875 = vperm.xlu2 %1652, %v809_v31  }
  0x46   : > { %292 = vperm.xlu1 %1651, %v812_v29   ;;  %880 = vperm.xlu0 %1650, %v810_v32  }
  0x4a   : > { %1459 = vmatmul.msk.f32.gmra.mxu0 %vm295_vm0, %v187_v33 }
  0x4c   : > { %1531 = vmatmul.msk.f32.gmra.mxu2 %vm295_vm0, %v187_v33 }
  0x4d   : > { %282 = vperm.xlu2 %1652, %v810_v32  }
  0x4e   : > { %870 = vperm.xlu1 %1651, %v808_v34   ;;  %287 = vperm.xlu0 %1650, %v811_v28  }
  0x52   : > { %1460 = vmatmul.msk.f32.gmra.mxu0 %vm295_vm0, %v188_v35 }
  0x54   : > { %1532 = vmatmul.msk.f32.gmra.mxu2 %vm295_vm0, %v188_v35 }
  0x55   : > { %860 = vperm.xlu2 %1652, %v806_v36  }
  0x56   : > { %277 = vperm.xlu1 %1651, %v809_v31   ;;  %865 = vperm.xlu0 %1650, %v807_v37  }
  0x5a   : > { %1461 = vmatmul.msk.f32.gmra.mxu0 %vm295_vm0, %v189_v38 }
  0x5c   : > { %1533 = vmatmul.msk.f32.gmra.mxu2 %vm295_vm0, %v189_v38 }
  0x5d   : > { %267 = vperm.xlu2 %1652, %v807_v37  }
  0x5e   : > { %855 = vperm.xlu1 %1651, %v805_v39   ;;  %272 = vperm.xlu0 %1650, %v808_v34  }
  0x62   : > { %1462 = vmatmul.msk.f32.gmra.mxu0 %vm295_vm0, %v190_v40 }
  0x64   : > { %1534 = vmatmul.msk.f32.gmra.mxu2 %vm295_vm0, %v190_v40 }
  0x65   : > { %509 = vperm.xlu2 %1652, %v1487_v41  }
  0x66   : > { %257 = vperm.xlu1 %1651, %v805_v39   ;;  %262 = vperm.xlu0 %1650, %v806_v36  }
  0x6a   : > { %1463 = vmatmul.msk.f32.gmra.mxu0 %vm295_vm0, %v191_v42 }
  0x6c   : > { %1535 = vmatmul.msk.f32.gmra.mxu2 %vm295_vm0, %v191_v42 }
  0x6d   : > { %524 = vperm.xlu2 %1652, %v1490_v43  }
  0x6e   : > { %519 = vperm.xlu1 %1651, %v1489_v44   ;;  %514 = vperm.xlu0 %1650, %v1488_v45  }
  0x6f   : > { %v238_v39 = vpop.permute.xlu2 %237 }
  0x72   : > { %1464 = vmatmul.msk.f32.gmra.mxu0 %vm295_vm0, %v192_v46 }
  0x74   : > { %1536 = vmatmul.msk.f32.gmra.mxu2 %vm295_vm0, %v192_v46 }
  0x75   : > { %539 = vperm.xlu2 %1652, %v1493_v47  }
  0x76   : > { %534 = vperm.xlu1 %1651, %v1492_v48   ;;  %529 = vperm.xlu0 %1650, %v1491_v49  }
  0x7a   : > { %1465 = vmatmul.msk.f32.gmra.mxu0 %vm295_vm0, %v193_v50 }
  0x7c   : > { %1537 = vmatmul.msk.f32.gmra.mxu2 %vm295_vm0, %v193_v50 }
  0x7d   : > { %554 = vperm.xlu2 %1652, %v1496_v51  }
  0x7e   : > { %549 = vperm.xlu1 %1651, %v1495_v52   ;;  %544 = vperm.xlu0 %1650, %v1494_v53  }
  0x82   : > { %1466 = vmatmul.msk.f32.gmra.mxu0 %vm295_vm0, %v194_v54 }
  0x84   : > { %1538 = vmatmul.msk.f32.gmra.mxu2 %vm295_vm0, %v194_v54 }
  0x85   : > { %569 = vperm.xlu2 %1652, %v1499_v55  }
  0x86   : > { %564 = vperm.xlu1 %1651, %v1498_v56   ;;  %559 = vperm.xlu0 %1650, %v1497_v57  }
  0x88   : > { %v2141_v58 = vpop.permute.xlu1 %227  ;;  %v218_v3 = vpop.permute.xlu0 %217 }
  0x8a   : > { %1467 = vmatmul.msk.f32.gmra.mxu0 %vm295_vm0, %v195_v59 }
  0x8c   : > { %1539 = vmatmul.msk.f32.gmra.mxu2 %vm295_vm0, %v195_v59 }
  0x8d   : > { %584 = vperm.xlu2 %1652, %v1502_v60  }
  0x8e   : > { %579 = vperm.xlu1 %1651, %v1501_v61   ;;  %574 = vperm.xlu0 %1650, %v1500_v62  }
  0x90   : > { %v2157_v63 = vpop.permute.xlu1 %232  ;;  %v2178_v9 = vpop.permute.xlu0 %222 }
  0x92   : > { %1468 = vmatmul.msk.f32.gmra.mxu0 %vm295_vm0, %v196_v0 }
  0x94   : > { %1540 = vmatmul.msk.f32.gmra.mxu2 %vm295_vm0, %v196_v0 }
  0x95   : > { %1114 = vperm.xlu2 %1652, %v1489_v44  }
  0x96   : > { %1109 = vperm.xlu1 %1651, %v1488_v45   ;;  %1104 = vperm.xlu0 %1650, %v1487_v41   ;;  %v243_v45 = vpop.permute.xlu2 %242 }
  0x98   : > { %v2164_v1 = vpop.permute.xlu1 %252  ;;  %v2182_v28 = vpop.permute.xlu0 %247 }
  0x9a   : > { %1469 = vmatmul.msk.f32.gmra.mxu0 %vm295_vm0, %v197_v2 }
  0x9c   : > { %1541 = vmatmul.msk.f32.gmra.mxu2 %vm295_vm0, %v197_v2 }
  0x9d   : > { %1129 = vperm.xlu2 %1652, %v1492_v48  }
  0x9e   : > { %1124 = vperm.xlu1 %1651, %v1491_v49   ;;  %1119 = vperm.xlu0 %1650, %v1490_v43  }
  0xa0   : > { %v2174_v8 = vpop.permute.xlu1 %840  ;;  %v2186_v32 = vpop.permute.xlu0 %845 }
  0xa2   : > { %1470 = vmatmul.msk.f32.gmra.mxu0 %vm295_vm0, %v198_v4 }
  0xa4   : > { %1542 = vmatmul.msk.f32.gmra.mxu2 %vm295_vm0, %v198_v4 }
  0xa5   : > { %1144 = vperm.xlu2 %1652, %v1495_v52  }
  0xa6   : > { %1139 = vperm.xlu1 %1651, %v1494_v53   ;;  %1134 = vperm.xlu0 %1650, %v1493_v47   ;;  %v851_v53 = vpop.permute.xlu2 %850 }
  0xa7   : > { %v361_v17 = vpop.f32.mrf.mxu0 }
  0xa8   : > { %v362_v18 = vadd.f32 %v361_v17, %v218_v3  ;;  %v2180_v25 = vpop.permute.xlu1 %825  ;;  %v2194_v36 = vpop.permute.xlu0 %830 }
  0xaa   : > { %v409_v44 = vsub.f32 0.0, %v362_v18 }
  0xac   : > { %v417_v48 = vmul.f32 1.442695, %v409_v44 }
  0xad   : > { %1159 = vperm.xlu2 %1652, %v1498_v56  }
  0xae   : > { %1154 = vperm.xlu1 %1651, %v1497_v57   ;;  %1149 = vperm.xlu0 %1650, %v1496_v51   ;;  %1653 = vpow2.f32 %v417_v48 }
  0xaf   : > { %v958_v26 = vpop.f32.mrf.mxu2  ;;  %v364_v27 = vpop.f32.mrf.mxu0 }
  0xb0   : > { %v2184_v29 = vpop.permute.xlu1 %890  ;;  %v816_v42 = vpop.permute.xlu0 %815 }
  0xb1   : > { %v959_v46 = vadd.f32 %v958_v26, %v816_v42 }
  0xb3   : > { %v1006_v50 = vsub.f32 0.0, %v959_v46 }
  0xb4   : > { %v1654_v56 = vpop.eup %1653 }
  0xb5   : > { %1174 = vperm.xlu2 %1652, %v1501_v61   ;;  %v1014_v52 = vmul.f32 1.442695, %v1006_v50  ;;  %v433_v59 = vadd.f32 1.0, %v1654_v56 }
  0xb6   : > { %1169 = vperm.xlu1 %1651, %v1500_v62   ;;  %1164 = vperm.xlu0 %1650, %v1499_v55   ;;  %v836_v62 = vpop.permute.xlu2 %835 }
  0xb7   : > { %v961_v30 = vpop.f32.mrf.mxu2  ;;  %v367_v31 = vpop.f32.mrf.mxu0  ;;  %1655 = vpow2.f32 %v1014_v52 }
  0xb8   : > { %v2190_v34 = vpop.permute.xlu1 %292  ;;  %1657 = vrcp.f32 %v433_v59 }
  0xbe   : > { %1179 = vperm.xlu0 %1650, %v1502_v60   ;;  %v1656_v60 = vpop.eup %1655  ;;  %v821_v48 = vpop.permute.xlu2 %820 }
  0xbf   : > { %v2188_v33 = vpop.f32.mrf.mxu2  ;;  %v2192_v35 = vpop.f32.mrf.mxu0  ;;  %v1030_v0 = vadd.f32 1.0, %v1656_v60 }
  0xc0   : > { %v2200_v40 = vpop.permute.xlu1 %870  ;;  %v1658_v18 = vpop.eup %1657 }
  0xc1   : > { %1659 = vrcp.f32 %v1030_v0 }
  0xc7   : > { %v2196_v37 = vpop.f32.mrf.mxu2  ;;  %v2198_v38 = vpop.f32.mrf.mxu0 }
  0xc8   : > { %v2204_v47 = vpop.permute.xlu1 %277  ;;  %v1660_v52 = vpop.eup %1659 }
  0xcf   : > { %v2202_v41 = vpop.f32.mrf.mxu2  ;;  %v376_v43 = vpop.f32.mrf.mxu0 }
  0xd0   : > { %v856_v54 = vpop.permute.xlu1 %855  ;;  %v377_v22 = vadd.f32 %v376_v43, %v243_v45  ;;  %v968_v45 = vadd.f32 %v2196_v37, %v2194_v36 }
  0xd2   : > { %v1009_v37 = vsub.f32 0.0, %v968_v45 }
  0xd7   : > { %v2206_v49 = vpop.f32.mrf.mxu2  ;;  %v379_v51 = vpop.f32.mrf.mxu0 }
  0xd8   : > { %v258_v2 = vpop.permute.xlu1 %257  ;;  %v974_v43 = vadd.f32 %v2206_v49, %v2174_v8 }
  0xda   : > { %v1011_v36 = vsub.f32 0.0, %v974_v43 }
  0xdf   : > { %v976_v55 = vpop.f32.mrf.mxu2  ;;  %v382_v57 = vpop.f32.mrf.mxu0 }
  0xe7   : > { %v979_v61 = vpop.f32.mrf.mxu2  ;;  %v385_v3 = vpop.f32.mrf.mxu0 }
  0xe8   : > { %v386_v4 = vadd.f32 %v385_v3, %v258_v2  ;;  %v2220_v2 = vpop.permute.xlu2 %885  ;;  %v2222_v3 = vpop.permute.xlu0 %880 }
  0xea   : > { %v449_v17 = vsub.f32 %v386_v4, %v2007_v23 }
  0xec   : > { %v2209_v26 = vmul.f32 %v1658_v18, %v449_v17  ;;  %v962_v18 = vadd.f32 %v961_v30, %v821_v48 }
  0xee   : > { %2604 = vst [vmem:[#allocation8_spill] sm:$0xff] %v2209_v26  ;;  %v1007_v26 = vsub.f32 0.0, %v962_v18 }
  0xef   : > { %v982_v42 = vpop.f32.mrf.mxu2  ;;  %v2211_v46 = vpop.f32.mrf.mxu0 }
  0xf0   : > { %v983_v44 = vadd.f32 %v982_v42, %v856_v54  ;;  %v365_v54 = vadd.f32 %v364_v27, %v2178_v9  ;;  %v380_v42 = vadd.f32 %v379_v51, %v2182_v28  ;;  %v2236_v23 = vpop.permute.xlu0 %287  ;;  %v371_v9 = vadd.f32 %v2192_v35, %v2157_v63 }
  0xf1   : > { %v374_v28 = vadd.f32 %v2198_v38, %v238_v39 }
  0xf2   : > { %v1046_v50 = vsub.f32 %v983_v44, %v2010_v24  ;;  %v410_v17 = vsub.f32 0.0, %v365_v54  ;;  %v2230_v44 = vpop.permute.xlu2 %875  ;;  %v415_v27 = vsub.f32 0.0, %v380_v42  ;;  %v412_v54 = vsub.f32 0.0, %v371_v9 }
  0xf3   : > { %v413_v18 = vsub.f32 0.0, %v374_v28  ;;  %v1020_v28 = vmul.f32 1.442695, %v1009_v37 }
  0xf4   : > { %v2214_v56 = vmul.f32 %v1660_v52, %v1046_v50  ;;  %v383_v50 = vadd.f32 %v382_v57, %v2164_v1  ;;  %v368_v52 = vadd.f32 %v367_v31, %v2141_v58  ;;  %v977_v1 = vadd.f32 %v976_v55, %v2186_v32 }
  0xf5   : > { %v1016_v58 = vmul.f32 1.442695, %v1007_v26  ;;  %v414_v31 = vsub.f32 0.0, %v377_v22  ;;  %v980_v57 = vadd.f32 %v979_v61, %v851_v53  ;;  %v971_v32 = vadd.f32 %v2202_v41, %v836_v62 }
  0xf6   : > { %2605 = vst [vmem:[#allocation9_spill] sm:$0xff] %v2214_v56  ;;  %v419_v56 = vmul.f32 1.442695, %v410_v17  ;;  %v416_v51 = vsub.f32 0.0, %v383_v50  ;;  %v411_v48 = vsub.f32 0.0, %v368_v52  ;;  %v1012_v38 = vsub.f32 0.0, %v977_v1 }
  0xf7   : > { %v2216_v59 = vpop.f32.mrf.mxu2  ;;  %v2218_v60 = vpop.f32.mrf.mxu0  ;;  %v429_v17 = vmul.f32 1.442695, %v415_v27  ;;  %v427_v22 = vmul.f32 1.442695, %v414_v31  ;;  %v1013_v53 = vsub.f32 0.0, %v980_v57  ;;  %v965_v55 = vadd.f32 %v2188_v33, %v2180_v25 }
  0xf8   : > { %1661 = vpow2.f32 %v419_v56  ;;  %v431_v63 = vmul.f32 1.442695, %v416_v51  ;;  %v421_v35 = vmul.f32 1.442695, %v411_v48  ;;  %v423_v61 = vmul.f32 1.442695, %v412_v54  ;;  %v2253_v26 = vpop.permute.xlu0 %865 }
  0xf9   : > { %1663 = vpow2.f32 %v1016_v58  ;;  %v425_v56 = vmul.f32 1.442695, %v413_v18  ;;  %v1026_v50 = vmul.f32 1.442695, %v1012_v38  ;;  %v1010_v52 = vsub.f32 0.0, %v971_v32 }
  0xfa   : > { %v283_v42 = vpop.permute.xlu2 %282  ;;  %1665 = vpow2.f32 %v429_v17  ;;  %v1028_v41 = vmul.f32 1.442695, %v1013_v53  ;;  %v1008_v9 = vsub.f32 0.0, %v965_v55  ;;  %v1024_v25 = vmul.f32 1.442695, %v1011_v36 }
  0xfb   : > { %1667 = vpow2.f32 %v431_v63  ;;  %v1022_v1 = vmul.f32 1.442695, %v1010_v52 }
  0xfc   : > { %1669 = vpow2.f32 %v421_v35  ;;  %v1018_v31 = vmul.f32 1.442695, %v1008_v9 }
  0xfd   : > { %1671 = vpow2.f32 %v427_v22 }
  0xfe   : > { %v1662_v49 = vpop.eup %1661  ;;  %1673 = vpow2.f32 %v423_v61 }
  0xff   : > { %v2224_v0 = vpop.f32.mrf.mxu2  ;;  %v2227_v4 = vpop.f32.mrf.mxu0  ;;  %v434_v62 = vadd.f32 1.0, %v1662_v49  ;;  %1675 = vpow2.f32 %v425_v56 }
 0x100   : > { %v1664_v27 = vpop.eup %1663  ;;  %1677 = vpow2.f32 %v1026_v50  ;;  %v273_v38 = vpop.permute.xlu0 %272 }
 0x101   : > { %v1666_v33 = vpop.eup %1665  ;;  %1679 = vpow2.f32 %v1028_v41 }
 0x102   : > { %v1668_v48 = vpop.eup %1667  ;;  %1681 = vrcp.f32 %v434_v62  ;;  %v2255_v17 = vpop.permute.xlu2 %860  ;;  %v439_v18 = vadd.f32 1.0, %v1666_v33 }
 0x103   : > { %v1670_v58 = vpop.eup %1669  ;;  %1683 = vpow2.f32 %v1024_v25  ;;  %v440_v63 = vadd.f32 1.0, %v1668_v48 }
 0x104   : > { %v1672_v54 = vpop.eup %1671  ;;  %1685 = vpow2.f32 %v1020_v28  ;;  %v435_v45 = vadd.f32 1.0, %v1670_v58 }
 0x105   : > { %v1674_v43 = vpop.eup %1673  ;;  %1687 = vpow2.f32 %v1022_v1  ;;  %v438_v22 = vadd.f32 1.0, %v1672_v54  ;;  %v1031_v1 = vadd.f32 1.0, %v1664_v27 }
 0x106   : > { %v1676_v35 = vpop.eup %1675  ;;  %1689 = vpow2.f32 %v1018_v31  ;;  %v436_v55 = vadd.f32 1.0, %v1674_v43  ;;  %v395_v31 = vadd.f32 %v2227_v4, %v273_v38 }
 0x107   : > { %v2234_v24 = vpop.f32.mrf.mxu2  ;;  %v2240_v30 = vpop.f32.mrf.mxu0  ;;  %1691 = vrcp.f32 %v439_v18  ;;  %v437_v56 = vadd.f32 1.0, %v1676_v35 }
 0x108   : > { %v1678_v32 = vpop.eup %1677  ;;  %1693 = vrcp.f32 %v440_v63  ;;  %v398_v33 = vadd.f32 %v2240_v30, %v2204_v47  ;;  %v263_v63 = vpop.permute.xlu0 %262 }
 0x109   : > { %v1680_v53 = vpop.eup %1679  ;;  %1695 = vrcp.f32 %v435_v45  ;;  %v1036_v50 = vadd.f32 1.0, %v1678_v32 }
 0x10a   : > { %v2258_v49 = vpop.eup %1681  ;;  %1697 = vrcp.f32 %v438_v22  ;;  %v1037_v62 = vadd.f32 1.0, %v1680_v53  ;;  %v453_v35 = vsub.f32 %v398_v33, %v1968_v13  ;;  %v452_v22 = vsub.f32 %v395_v31, %v1976_v15 }
 0x10b   : > { %v1684_v37 = vpop.eup %1683  ;;  %1699 = vrcp.f32 %v436_v55 }
 0x10c   : > { %v1686_v41 = vpop.eup %1685  ;;  %1701 = vrcp.f32 %v437_v56  ;;  %v1035_v58 = vadd.f32 1.0, %v1684_v37 }
 0x10d   : > { %v1688_v25 = vpop.eup %1687  ;;  %1703 = vrcp.f32 %v1036_v50  ;;  %v1033_v30 = vadd.f32 1.0, %v1686_v41  ;;  %v992_v50 = vadd.f32 %v2234_v24, %v2200_v40 }
 0x10e   : > { %v1690_v48 = vpop.eup %1689  ;;  %v1034_v43 = vadd.f32 1.0, %v1688_v25  ;;  %1705 = vrcp.f32 %v1037_v62 }
 0x10f   : > { %v2248_v39 = vpop.f32.mrf.mxu2  ;;  %v400_v8 = vpop.f32.mrf.mxu0  ;;  %1707 = vrcp.f32 %v1035_v58  ;;  %v1032_v37 = vadd.f32 1.0, %v1690_v48  ;;  %v1049_v58 = vsub.f32 %v992_v50, %v1981_v16  ;;  %v1486_v50 = vld [vmem:[%s2592_s1 + $0xf8] sm:$0xff] }
 0x110   : > { %v401_v52 = vadd.f32 %v400_v8, %v283_v42  ;;  %v1692_v42 = vpop.eup %1691  ;;  %v268_v8 = vpop.permute.xlu2 %267  ;;  %v995_v53 = vadd.f32 %v2248_v39, %v2230_v44  ;;  %1709 = vrcp.f32 %v1034_v43 }
 0x111   : > { %v1694_v47 = vpop.eup %1693  ;;  %1711 = vrcp.f32 %v1033_v30 }
 0x112   : > { %v1696_v27 = vpop.eup %1695  ;;  %v1050_v24 = vsub.f32 %v995_v53, %v1973_v14  ;;  %1713 = vrcp.f32 %v1032_v37  ;;  %v1477_v53 = vld [vmem:[%s2592_s1 + $0xb0] sm:$0xff]  ;;  %v1484_v37 = vld [vmem:[%s2592_s1 + $0xe8] sm:$0xff] }
 0x113   : > { %v1698_v32 = vpop.eup %1697  ;;  %1715 = vrcp.f32 %v1031_v1 }
 0x117   : > { %v997_v51 = vpop.f32.mrf.mxu2  ;;  %v403_v57 = vpop.f32.mrf.mxu0 }
 0x118   : > { %v404_v61 = vadd.f32 %v403_v57, %v2236_v23  ;;  %v454_v57 = vsub.f32 %v401_v52, %v1961_v11  ;;  %v998_v4 = vadd.f32 %v997_v51, %v2222_v3 }
 0x11a   : > { %v455_v23 = vsub.f32 %v404_v61, %v1947_v7  ;;  %v1700_v61 = vpop.eup %1699  ;;  %v1051_v39 = vsub.f32 %v998_v4, %v1965_v12  ;;  %v2610_v4 = vld [vmem:[#allocation7_spill] sm:$0xff] }
 0x11b   : > { %v1702_v51 = vpop.eup %1701  ;;  %v460_v25 = vmul.f32 %v1700_v61, %v452_v22  ;;  %v1476_v22 = vld [vmem:[%s2592_s1 + $0xa8] sm:$0xff]  ;;  %v1479_v61 = vld [vmem:[%s2592_s1 + $0xc0] sm:$0xff] }
 0x11c   : > { %v463_v45 = vmul.f32 %v1692_v42, %v455_v23  ;;  %v1704_v52 = vpop.eup %1703  ;;  %v461_v44 = vmul.f32 %v1702_v51, %v453_v35  ;;  %v1483_v51 = vld [vmem:[%s2592_s1 + $0xe0] sm:$0xff] }
 0x11f   : > { %v1000_v36 = vpop.f32.mrf.mxu2  ;;  %v406_v9 = vpop.f32.mrf.mxu0 }
 0x120   : > { %v407_v28 = vadd.f32 %v406_v9, %v2190_v34  ;;  %v1001_v54 = vadd.f32 %v1000_v36, %v2220_v2  ;;  %v392_v34 = vadd.f32 %v2218_v60, %v268_v8  ;;  %v389_v2 = vadd.f32 %v2211_v46, %v263_v63 }
 0x121   : > { %v462_v60 = vmul.f32 %v1698_v32, %v454_v57  ;;  %v989_v9 = vadd.f32 %v2224_v0, %v2253_v26  ;;  %v2302_v0 = vadd.f32 %v461_v44, %v1968_v13  ;;  %v1474_v32 = vld [vmem:[%s2592_s1 + $0x98] sm:$0xff]  ;;  %v515_v44 = vpop.permute.xlu0 %514 }
 0x122   : > { %v456_v18 = vsub.f32 %v407_v28, %v1941_v5  ;;  %v1052_v56 = vsub.f32 %v1001_v54, %v1958_v10  ;;  %v451_v46 = vsub.f32 %v392_v34, %v1992_v19  ;;  %v450_v62 = vsub.f32 %v389_v2, %v1999_v21  ;;  %v1475_v2 = vld [vmem:[%s2592_s1 + $0xa0] sm:$0xff] }
 0x123   : > { %v2295_v23 = vadd.f32 %v462_v60, %v1961_v11  ;;  %v1048_v8 = vsub.f32 %v989_v9, %v1995_v20  ;;  %v1480_v60 = vld [vmem:[%s2592_s1 + $0xc8] sm:$0xff] }
 0x124   : > { %v464_v38 = vmul.f32 %v1694_v47, %v456_v18  ;;  %v1060_v40 = vmul.f32 %v1704_v52, %v1052_v56  ;;  %v459_v48 = vmul.f32 %v1696_v27, %v451_v46  ;;  %v458_v11 = vmul.f32 %v2258_v49, %v450_v62  ;;  %v1481_v56 = vld [vmem:[%s2592_s1 + $0xd0] sm:$0xff]  ;;  %v510_v52 = vpop.permute.xlu2 %509 }
 0x125   : > { %v1485_v46 = vld [vmem:[%s2592_s1 + $0xf0] sm:$0xff] }
 0x126   : > { %v2278_v3 = vadd.f32 %v464_v38, %v1941_v5  ;;  %v1706_v5 = vpop.eup %1705  ;;  %v2315_v13 = vadd.f32 %v1958_v10, %v1060_v40  ;;  %v2321_v49 = vadd.f32 %v459_v48, %v1992_v19  ;;  %v2329_v10 = vadd.f32 %v458_v11, %v1999_v21  ;;  %v2608_v19 = vld [vmem:[#allocation8_spill] sm:$0xff]  ;;  %v1471_v21 = vld [vmem:[%s2592_s1 + $0x80] sm:$0xff]  ;;  %v1473_v38 = vld [vmem:[%s2592_s1 + $0x90] sm:$0xff] }
 0x127   : > { %v1003_v55 = vpop.f32.mrf.mxu2  ;;  %v1708_v28 = vpop.eup %1707 }
 0x128   : > { %v1004_v36 = vadd.f32 %v1003_v55, %v2184_v29  ;;  %643 = vmatpush.msra.mxu1 %v2278_v3  ;;  %v2287_v29 = vadd.f32 %v463_v45, %v1947_v7  ;;  %v986_v7 = vadd.f32 %v2216_v59, %v2255_v17  ;;  %v1059_v31 = vmul.f32 %v1708_v28, %v1051_v39  ;;  %v1710_v42 = vpop.eup %1709  ;;  %v1478_v55 = vld [vmem:[%s2592_s1 + $0xb8] sm:$0xff] }
 0x129   : > { %v1058_v57 = vmul.f32 %v1710_v42, %v1050_v24  ;;  %v2312_v59 = vadd.f32 %v460_v25, %v1976_v15  ;;  %v1712_v17 = vpop.eup %1711  ;;  %v2438_v62 = vpop.permute.xlu0 %529 }
 0x12a   : > { %v1053_v41 = vsub.f32 %v1004_v36, %v1944_v6  ;;  %644 = vmatpush.msra.mxu1 %v2287_v29  ;;  %v1057_v18 = vmul.f32 %v1712_v17, %v1049_v58  ;;  %v2324_v1 = vadd.f32 %v1965_v12, %v1059_v31  ;;  %v1714_v47 = vpop.eup %1713  ;;  %v2607_v12 = vld [vmem:[#allocation6_spill] sm:$0xff]  ;;  %v1482_v36 = vld [vmem:[%s2592_s1 + $0xd8] sm:$0xff] }
 0x12b   : > { %v1056_v15 = vmul.f32 %v1714_v47, %v1048_v8  ;;  %v2332_v30 = vadd.f32 %v1973_v14, %v1058_v57  ;;  %v1716_v43 = vpop.eup %1715  ;;  %v2338_v27 = vadd.f32 %v2608_v19, %v2607_v12 }
 0x12c   : > { %v1061_v33 = vmul.f32 %v1706_v5, %v1053_v41  ;;  %645 = vmatpush.msra.mxu1 %v2295_v23  ;;  %v2341_v63 = vadd.f32 %v1981_v16, %v1057_v18  ;;  %v2609_v16 = vld [vmem:[#allocation9_spill] sm:$0xff]  ;;  %v525_v41 = vpop.permute.xlu2 %524  ;;  %v520_v5 = vpop.permute.xlu1 %519 }
 0x12d   : > { %v2349_v14 = vadd.f32 %v1995_v20, %v1056_v15  ;;  %v2359_v45 = vadd.f32 %v2610_v4, %v2609_v16  ;;  %v1472_v20 = vld [vmem:[%s2592_s1 + $0x88] sm:$0xff] }
 0x12e   : > { %v2305_v26 = vadd.f32 %v1944_v6, %v1061_v33  ;;  %646 = vmatpush.msra.mxu1 %v2302_v0  ;;  %v2606_v6 = vld [vmem:[#allocation5_spill] sm:$0xff] }
 0x12f   : > { %v1047_v54 = vsub.f32 %v986_v7, %v2606_v6 }
 0x130   : > { %1238 = vmatpush.msra.mxu3 %v2305_v26  ;;  %647 = vmatpush.msra.mxu1 %v2312_v59 }
 0x131   : > { %v1055_v34 = vmul.f32 %v1716_v43, %v1047_v54  ;;  %v2444_v28 = vpop.permute.xlu0 %544 }
 0x132   : > { %1239 = vmatpush.msra.mxu3 %v2315_v13  ;;  %648 = vmatpush.msra.mxu1 %v2321_v49 }
 0x133   : > { %v2354_v35 = vadd.f32 %v2606_v6, %v1055_v34 }
 0x134   : > { %1240 = vmatpush.msra.mxu3 %v2324_v1  ;;  %649 = vmatpush.msra.mxu1 %v2329_v10  ;;  %v2440_v24 = vpop.permute.xlu2 %539  ;;  %v2442_v40 = vpop.permute.xlu1 %534 }
 0x136   : > { %1241 = vmatpush.msra.mxu3 %v2332_v30  ;;  %650 = vmatpush.msra.mxu1 %v2338_v27 }
 0x137   : > { %1503 = vmatmul.msk.f32.vlgmr.msra.gmra.mxu1 %vm295_vm0, %v1471_v21 }
 0x138   : > { %1242 = vmatpush.msra.mxu3 %v2341_v63 }
 0x139   : > { %v2448_v42 = vpop.permute.xlu0 %559 }
 0x13a   : > { %1243 = vmatpush.msra.mxu3 %v2349_v14 }
 0x13c   : > { %1244 = vmatpush.msra.mxu3 %v2354_v35  ;;  %v2446_v58 = vpop.permute.xlu2 %554  ;;  %v550_v31 = vpop.permute.xlu1 %549 }
 0x13e   : > { %1245 = vmatpush.msra.mxu3 %v2359_v45 }
 0x13f   : > { %1575 = vmatmul.msk.f32.vlgmr.msra.gmra.mxu3 %vm295_vm0, %v1471_v21  ;;  %1504 = vmatmul.msk.f32.gmra.mxu1 %vm295_vm0, %v1472_v20 }
 0x141   : > { %v2456_v18 = vpop.permute.xlu0 %574 }
 0x144   : > { %v2450_v57 = vpop.permute.xlu2 %569  ;;  %v2452_v17 = vpop.permute.xlu1 %564 }
 0x147   : > { %1576 = vmatmul.msk.f32.gmra.mxu3 %vm295_vm0, %v1472_v20  ;;  %1505 = vmatmul.msk.f32.gmra.mxu1 %vm295_vm0, %v1473_v38 }
 0x149   : > { %v1105_v16 = vpop.permute.xlu0 %1104 }
 0x14c   : > { %v2462_v34 = vpop.permute.xlu2 %584  ;;  %v2464_v21 = vpop.permute.xlu1 %579 }
 0x14f   : > { %1577 = vmatmul.msk.f32.gmra.mxu3 %vm295_vm0, %v1473_v38  ;;  %1506 = vmatmul.msk.f32.gmra.mxu1 %vm295_vm0, %v1474_v32 }
 0x157   : > { %1578 = vmatmul.msk.f32.gmra.mxu3 %vm295_vm0, %v1474_v32  ;;  %1507 = vmatmul.msk.f32.gmra.mxu1 %vm295_vm0, %v1475_v2 }
 0x15f   : > { %1579 = vmatmul.msk.f32.gmra.mxu3 %vm295_vm0, %v1475_v2  ;;  %1508 = vmatmul.msk.f32.gmra.mxu1 %vm295_vm0, %v1476_v22 }
 0x167   : > { %1580 = vmatmul.msk.f32.gmra.mxu3 %vm295_vm0, %v1476_v22  ;;  %1509 = vmatmul.msk.f32.gmra.mxu1 %vm295_vm0, %v1477_v53 }
 0x16f   : > { %1581 = vmatmul.msk.f32.gmra.mxu3 %vm295_vm0, %v1477_v53  ;;  %1510 = vmatmul.msk.f32.gmra.mxu1 %vm295_vm0, %v1478_v55 }
 0x177   : > { %1582 = vmatmul.msk.f32.gmra.mxu3 %vm295_vm0, %v1478_v55  ;;  %1511 = vmatmul.msk.f32.gmra.mxu1 %vm295_vm0, %v1479_v61 }
 0x17f   : > { %1583 = vmatmul.msk.f32.gmra.mxu3 %vm295_vm0, %v1479_v61  ;;  %1512 = vmatmul.msk.f32.gmra.mxu1 %vm295_vm0, %v1480_v60  ;;  %v1115_v61 = vpop.permute.xlu2 %1114 }
 0x187   : > { %1584 = vmatmul.msk.f32.gmra.mxu3 %vm295_vm0, %v1480_v60  ;;  %1513 = vmatmul.msk.f32.gmra.mxu1 %vm295_vm0, %v1481_v56  ;;  %v1110_v60 = vpop.permute.xlu1 %1109 }
 0x18f   : > { %1585 = vmatmul.msk.f32.gmra.mxu3 %vm295_vm0, %v1481_v56  ;;  %1514 = vmatmul.msk.f32.gmra.mxu1 %vm295_vm0, %v1482_v36 }
 0x197   : > { %1586 = vmatmul.msk.f32.gmra.mxu3 %vm295_vm0, %v1482_v36  ;;  %1515 = vmatmul.msk.f32.gmra.mxu1 %vm295_vm0, %v1483_v51 }
 0x19f   : > { %1587 = vmatmul.msk.f32.gmra.mxu3 %vm295_vm0, %v1483_v51  ;;  %1516 = vmatmul.msk.f32.gmra.mxu1 %vm295_vm0, %v1484_v37 }
 0x1a7   : > { %1588 = vmatmul.msk.f32.gmra.mxu3 %vm295_vm0, %v1484_v37  ;;  %1517 = vmatmul.msk.f32.gmra.mxu1 %vm295_vm0, %v1485_v46 }
 0x1af   : > { %1589 = vmatmul.msk.f32.gmra.mxu3 %vm295_vm0, %v1485_v46  ;;  %1518 = vmatmul.msk.f32.gmra.mxu1 %vm295_vm0, %v1486_v50 }
 0x1b4   : > { %v652_v39 = vpop.f32.mrf.mxu1 }
 0x1b5   : > { %v653_v54 = vadd.f32 %v652_v39, %v510_v52 }
 0x1b7   : > { %1590 = vmatmul.msk.f32.gmra.mxu3 %vm295_vm0, %v1486_v50  ;;  %v700_v15 = vsub.f32 0.0, %v653_v54 }
 0x1b9   : > { %v708_v12 = vmul.f32 1.442695, %v700_v15 }
 0x1bb   : > { %1717 = vpow2.f32 %v708_v12 }
 0x1bc   : > { %v655_v9 = vpop.f32.mrf.mxu1 }
 0x1bd   : > { %v656_v19 = vadd.f32 %v655_v9, %v515_v44  ;;  %v1120_v9 = vpop.permute.xlu0 %1119 }
 0x1bf   : > { %v701_v20 = vsub.f32 0.0, %v656_v19  ;;  %v2475_v19 = vpop.permute.xlu2 %1129 }
 0x1c1   : > { %v710_v22 = vmul.f32 1.442695, %v701_v20  ;;  %v1718_v55 = vpop.eup %1717 }
 0x1c2   : > { %v1247_v25 = vpop.f32.mrf.mxu3  ;;  %v724_v46 = vadd.f32 1.0, %v1718_v55 }
 0x1c3   : > { %v1248_v38 = vadd.f32 %v1247_v25, %v1105_v16  ;;  %1719 = vpow2.f32 %v710_v22 }
 0x1c4   : > { %v658_v33 = vpop.f32.mrf.mxu1 }
 0x1c5   : > { %v659_v32 = vadd.f32 %v658_v33, %v520_v5  ;;  %v1295_v53 = vsub.f32 0.0, %v1248_v38 }
 0x1c7   : > { %v702_v56 = vsub.f32 0.0, %v659_v32  ;;  %v1303_v51 = vmul.f32 1.442695, %v1295_v53 }
 0x1c9   : > { %v712_v50 = vmul.f32 1.442695, %v702_v56  ;;  %1721 = vpow2.f32 %v1303_v51  ;;  %v1720_v5 = vpop.eup %1719 }
 0x1ca   : > { %v1250_v7 = vpop.f32.mrf.mxu3  ;;  %1723 = vrcp.f32 %v724_v46 }
 0x1cb   : > { %v1251_v37 = vadd.f32 %v1250_v7, %v1110_v60  ;;  %1725 = vpow2.f32 %v712_v50  ;;  %v725_v7 = vadd.f32 1.0, %v1720_v5 }
 0x1cc   : > { %v661_v48 = vpop.f32.mrf.mxu1 }
 0x1cd   : > { %v1296_v44 = vsub.f32 0.0, %v1251_v37  ;;  %v662_v39 = vadd.f32 %v661_v48, %v525_v41 }
 0x1cf   : > { %v1305_v33 = vmul.f32 1.442695, %v1296_v44  ;;  %v703_v54 = vsub.f32 0.0, %v662_v39  ;;  %v1722_v16 = vpop.eup %1721  ;;  %v1145_v39 = vpop.permute.xlu2 %1144 }
 0x1d0   : > { %v1724_v38 = vpop.eup %1723 }
 0x1d1   : > { %1727 = vpow2.f32 %v1305_v33  ;;  %v714_v32 = vmul.f32 1.442695, %v703_v54  ;;  %v1726_v55 = vpop.eup %1725 }
 0x1d2   : > { %v1253_v11 = vpop.f32.mrf.mxu3  ;;  %1729 = vrcp.f32 %v725_v7  ;;  %v726_v46 = vadd.f32 1.0, %v1726_v55 }
 0x1d3   : > { %v1254_v15 = vadd.f32 %v1253_v11, %v1115_v61  ;;  %v1125_v61 = vpop.permute.xlu1 %1124  ;;  %1731 = vpow2.f32 %v714_v32 }
 0x1d4   : > { %v664_v8 = vpop.f32.mrf.mxu1 }
 0x1d5   : > { %v665_v41 = vadd.f32 %v664_v8, %v2438_v62  ;;  %v1297_v22 = vsub.f32 0.0, %v1254_v15  ;;  %v2489_v8 = vpop.permute.xlu0 %1134 }
 0x1d7   : > { %v704_v60 = vsub.f32 0.0, %v665_v41  ;;  %v1307_v51 = vmul.f32 1.442695, %v1297_v22  ;;  %v1728_v50 = vpop.eup %1727 }
 0x1d8   : > { %v1730_v44 = vpop.eup %1729 }
 0x1d9   : > { %v716_v5 = vmul.f32 1.442695, %v704_v60  ;;  %v1732_v15 = vpop.eup %1731 }
 0x1da   : > { %v2454_v6 = vpop.f32.mrf.mxu3 }
 0x1db   : > { %v1257_v37 = vadd.f32 %v2454_v6, %v1120_v9  ;;  %v2499_v22 = vpop.permute.xlu1 %1139 }
 0x1dc   : > { %v2458_v47 = vpop.f32.mrf.mxu1 }
 0x1dd   : > { %v1298_v9 = vsub.f32 0.0, %v1257_v37  ;;  %v1150_v60 = vpop.permute.xlu0 %1149 }
 0x1df   : > { %v1309_v41 = vmul.f32 1.442695, %v1298_v9 }
 0x1e2   : > { %v2460_v43 = vpop.f32.mrf.mxu3 }
 0x1e4   : > { %v2466_v4 = vpop.f32.mrf.mxu1 }
 0x1ea   : > { %v2468_v2 = vpop.f32.mrf.mxu3 }
 0x1ec   : > { %v2470_v36 = vpop.f32.mrf.mxu1 }
 0x1f2   : > { %v2472_v52 = vpop.f32.mrf.mxu3 }
 0x1f4   : > { %v676_v25 = vpop.f32.mrf.mxu1 }
 0x1f5   : > { %v677_v12 = vadd.f32 %v676_v25, %v550_v31  ;;  %v1319_v31 = vadd.f32 1.0, %v1722_v16  ;;  %v668_v25 = vadd.f32 %v2458_v47, %v2442_v40  ;;  %v1260_v40 = vadd.f32 %v2460_v43, %v1125_v61 }
 0x1f6   : > { %v671_v43 = vadd.f32 %v2466_v4, %v2440_v24  ;;  %v1263_v24 = vadd.f32 %v2468_v2, %v2475_v19 }
 0x1f7   : > { %v740_v20 = vsub.f32 %v677_v12, %v2338_v27  ;;  %1733 = vrcp.f32 %v1319_v31 }
 0x1f8   : > { %1735 = vpow2.f32 %v1307_v51  ;;  %v1299_v51 = vsub.f32 0.0, %v1260_v40  ;;  %v1300_v2 = vsub.f32 0.0, %v1263_v24 }
 0x1f9   : > { %v748_v53 = vmul.f32 %v1724_v38, %v740_v20  ;;  %1737 = vrcp.f32 %v726_v46  ;;  %v705_v20 = vsub.f32 0.0, %v668_v25 }
 0x1fa   : > { %v2481_v48 = vpop.f32.mrf.mxu3  ;;  %1739 = vpow2.f32 %v716_v5  ;;  %v1311_v5 = vmul.f32 1.442695, %v1299_v51 }
 0x1fb   : > { %v756_v11 = vadd.f32 %v748_v53, %v2338_v27  ;;  %v727_v53 = vadd.f32 1.0, %v1732_v15 }
 0x1fc   : > { %v679_v56 = vpop.f32.mrf.mxu1 }
 0x1fd   : > { %764 = vst [vmem:[%s2485_s6] sm:$0xff] %v756_v11  ;;  %v680_v62 = vadd.f32 %v679_v56, %v2446_v58  ;;  %v1320_v58 = vadd.f32 1.0, %v1728_v50  ;;  %v1734_v16 = vpop.eup %1733  ;;  %v718_v56 = vmul.f32 1.442695, %v705_v20 }
 0x1fe   : > { %v1736_v55 = vpop.eup %1735 }
 0x1ff   : > { %v741_v27 = vsub.f32 %v680_v62, %v2329_v10  ;;  %1741 = vrcp.f32 %v1320_v58  ;;  %v1738_v11 = vpop.eup %1737  ;;  %v1321_v46 = vadd.f32 1.0, %v1736_v55  ;;  %v1155_v58 = vpop.permute.xlu1 %1154 }
 0x200   : > { %1743 = vpow2.f32 %v1309_v41  ;;  %v1740_v62 = vpop.eup %1739 }
 0x201   : > { %v749_v33 = vmul.f32 %v1730_v44, %v741_v27  ;;  %1745 = vrcp.f32 %v727_v53  ;;  %v706_v44 = vsub.f32 0.0, %v671_v43 }
 0x202   : > { %v1271_v6 = vpop.f32.mrf.mxu3  ;;  %1747 = vpow2.f32 %v718_v56 }
 0x203   : > { %v1272_v54 = vadd.f32 %v1271_v6, %v1145_v39  ;;  %v757_v12 = vadd.f32 %v749_v33, %v2329_v10  ;;  %1749 = vrcp.f32 %v1321_v46  ;;  %v728_v6 = vadd.f32 1.0, %v1740_v62 }
 0x204   : > { %v682_v38 = vpop.f32.mrf.mxu1  ;;  %v720_v15 = vmul.f32 1.442695, %v706_v44  ;;  %1751 = vpow2.f32 %v1311_v5 }
 0x205   : > { %v1335_v7 = vsub.f32 %v1272_v54, %v2359_v45  ;;  %765 = vst [vmem:[%s2485_s6 + $0x8] sm:$0xff] %v757_v12  ;;  %v683_v32 = vadd.f32 %v682_v38, %v2448_v42  ;;  %v1742_v27 = vpop.eup %1741  ;;  %v674_v12 = vadd.f32 %v2470_v36, %v2444_v28  ;;  %1753 = vrcp.f32 %v728_v6 }
 0x206   : > { %v1744_v9 = vpop.eup %1743  ;;  %1755 = vpow2.f32 %v720_v15  ;;  %v1266_v28 = vadd.f32 %v2472_v52, %v2489_v8 }
 0x207   : > { %v1343_v47 = vmul.f32 %v1734_v16, %v1335_v7  ;;  %v742_v31 = vsub.f32 %v683_v32, %v2321_v49  ;;  %v1746_v54 = vpop.eup %1745  ;;  %v1322_v20 = vadd.f32 1.0, %v1744_v9  ;;  %v707_v40 = vsub.f32 0.0, %v674_v12 }
 0x208   : > { %v1748_v16 = vpop.eup %1747  ;;  %v1313_v32 = vmul.f32 1.442695, %v1300_v2 }
 0x209   : > { %v1351_v10 = vadd.f32 %v1343_v47, %v2359_v45  ;;  %v750_v42 = vmul.f32 %v1738_v11, %v742_v31  ;;  %v1750_v41 = vpop.eup %1749  ;;  %1757 = vrcp.f32 %v1322_v20  ;;  %v729_v55 = vadd.f32 1.0, %v1748_v16 }
 0x20a   : > { %v1274_v61 = vpop.f32.mrf.mxu3  ;;  %v722_v56 = vmul.f32 1.442695, %v707_v40  ;;  %1759 = vpow2.f32 %v1313_v32 }
 0x20b   : > { %1591 = vst [vmem:[%s2485_s6 + $0x40] sm:$0xff] %v1351_v10  ;;  %v1275_v37 = vadd.f32 %v1274_v61, %v1150_v60  ;;  %v758_v45 = vadd.f32 %v750_v42, %v2321_v49  ;;  %v1752_v10 = vpop.eup %1751  ;;  %v1160_v60 = vpop.permute.xlu2 %1159  ;;  %v1301_v61 = vsub.f32 0.0, %v1266_v28  ;;  %1761 = vrcp.f32 %v729_v55 }
 0x20c   : > { %v685_v39 = vpop.f32.mrf.mxu1  ;;  %v1754_v11 = vpop.eup %1753  ;;  %1763 = vpow2.f32 %v722_v56 }
 0x20d   : > { %v1336_v50 = vsub.f32 %v1275_v37, %v2354_v35  ;;  %766 = vst [vmem:[%s2485_s6 + $0x10] sm:$0xff] %v758_v45  ;;  %v686_v25 = vadd.f32 %v685_v39, %v2452_v17  ;;  %v1756_v51 = vpop.eup %1755  ;;  %v1315_v46 = vmul.f32 1.442695, %v1301_v61  ;;  %v1269_v45 = vadd.f32 %v2481_v48, %v2499_v22 }
 0x20e   : > { %v730_v44 = vadd.f32 1.0, %v1756_v51 }
 0x20f   : > { %v1344_v4 = vmul.f32 %v1742_v27, %v1336_v50  ;;  %v743_v33 = vsub.f32 %v686_v25, %v2312_v59  ;;  %v1302_v6 = vsub.f32 0.0, %v1269_v45 }
 0x211   : > { %v1352_v49 = vadd.f32 %v1344_v4, %v2354_v35  ;;  %v751_v19 = vmul.f32 %v1746_v54, %v743_v33  ;;  %v1165_v4 = vpop.permute.xlu0 %1164 }
 0x212   : > { %v1277_v7 = vpop.f32.mrf.mxu3 }
 0x213   : > { %1592 = vst [vmem:[%s2485_s6 + $0x48] sm:$0xff] %v1352_v49  ;;  %v1278_v17 = vadd.f32 %v1277_v7, %v1155_v58  ;;  %v759_v35 = vadd.f32 %v751_v19, %v2312_v59  ;;  %v1317_v58 = vmul.f32 1.442695, %v1302_v6 }
 0x214   : > { %v688_v47 = vpop.f32.mrf.mxu1 }
 0x215   : > { %v1337_v38 = vsub.f32 %v1278_v17, %v2349_v14  ;;  %767 = vst [vmem:[%s2485_s6 + $0x18] sm:$0xff] %v759_v35  ;;  %v689_v53 = vadd.f32 %v688_v47, %v2450_v57  ;;  %v1323_v57 = vadd.f32 1.0, %v1752_v10 }
 0x217   : > { %v1345_v36 = vmul.f32 %v1750_v41, %v1337_v38  ;;  %v744_v31 = vsub.f32 %v689_v53, %v2302_v0  ;;  %1765 = vrcp.f32 %v1323_v57 }
 0x218   : > { %1767 = vpow2.f32 %v1315_v46 }
 0x219   : > { %v1353_v59 = vadd.f32 %v1345_v36, %v2349_v14  ;;  %v752_v52 = vmul.f32 %v1754_v11, %v744_v31  ;;  %v1758_v14 = vpop.eup %1757  ;;  %1769 = vrcp.f32 %v730_v44 }
 0x21a   : > { %v1280_v43 = vpop.f32.mrf.mxu3  ;;  %v1760_v39 = vpop.eup %1759 }
 0x21b   : > { %1593 = vst [vmem:[%s2485_s6 + $0x50] sm:$0xff] %v1353_v59  ;;  %v1281_v8 = vadd.f32 %v1280_v43, %v1160_v60  ;;  %v760_v42 = vadd.f32 %v752_v52, %v2302_v0  ;;  %v1762_v24 = vpop.eup %1761  ;;  %v1324_v49 = vadd.f32 1.0, %v1760_v39  ;;  %v1175_v59 = vpop.permute.xlu2 %1174 }
 0x21c   : > { %v691_v62 = vpop.f32.mrf.mxu1  ;;  %v1764_v22 = vpop.eup %1763 }
 0x21d   : > { %v1338_v37 = vsub.f32 %v1281_v8, %v2341_v63  ;;  %768 = vst [vmem:[%s2485_s6 + $0x20] sm:$0xff] %v760_v42  ;;  %v692_v27 = vadd.f32 %v691_v62, %v2456_v18  ;;  %1771 = vrcp.f32 %v1324_v49  ;;  %v731_v7 = vadd.f32 1.0, %v1764_v22  ;;  %v1180_v52 = vpop.permute.xlu0 %1179 }
 0x21e   : > { %1773 = vpow2.f32 %v1317_v58 }
 0x21f   : > { %v1346_v50 = vmul.f32 %v1758_v14, %v1338_v37  ;;  %v745_v0 = vsub.f32 %v692_v27, %v2295_v23  ;;  %1775 = vrcp.f32 %v731_v7 }
 0x221   : > { %v1354_v5 = vadd.f32 %v1346_v50, %v2341_v63  ;;  %v753_v9 = vmul.f32 %v1762_v24, %v745_v0  ;;  %v1766_v63 = vpop.eup %1765 }
 0x222   : > { %v1283_v25 = vpop.f32.mrf.mxu3  ;;  %v1768_v2 = vpop.eup %1767 }
 0x223   : > { %1594 = vst [vmem:[%s2485_s6 + $0x58] sm:$0xff] %v1354_v5  ;;  %v1284_v48 = vadd.f32 %v1283_v25, %v1165_v4  ;;  %v761_v18 = vadd.f32 %v753_v9, %v2295_v23  ;;  %v1770_v16 = vpop.eup %1769  ;;  %v1170_v23 = vpop.permute.xlu1 %1169  ;;  %v1325_v41 = vadd.f32 1.0, %v1768_v2 }
 0x224   : > { %v694_v54 = vpop.f32.mrf.mxu1  ;;  %v1772_v47 = vpop.eup %1771 }
 0x225   : > { %v1339_v33 = vsub.f32 %v1284_v48, %v2332_v30  ;;  %769 = vst [vmem:[%s2485_s6 + $0x28] sm:$0xff] %v761_v18  ;;  %v695_v12 = vadd.f32 %v694_v54, %v2464_v21  ;;  %1777 = vrcp.f32 %v1325_v41  ;;  %v1774_v36 = vpop.eup %1773 }
 0x226   : > { %v1776_v10 = vpop.eup %1775  ;;  %v1326_v60 = vadd.f32 1.0, %v1774_v36 }
 0x227   : > { %v1347_v15 = vmul.f32 %v1766_v63, %v1339_v33  ;;  %v746_v17 = vsub.f32 %v695_v12, %v2287_v29 }
 0x228   : > { %1779 = vrcp.f32 %v1326_v60 }
 0x229   : > { %v1355_v19 = vadd.f32 %v1347_v15, %v2332_v30  ;;  %v754_v35 = vmul.f32 %v1770_v16, %v746_v17 }
 0x22a   : > { %v1286_v20 = vpop.f32.mrf.mxu3 }
 0x22b   : > { %1595 = vst [vmem:[%s2485_s6 + $0x60] sm:$0xff] %v1355_v19  ;;  %v1287_v38 = vadd.f32 %v1286_v20, %v1170_v23  ;;  %v762_v21 = vadd.f32 %v754_v35, %v2287_v29  ;;  %v1778_v43 = vpop.eup %1777 }
 0x22c   : > { %v697_v32 = vpop.f32.mrf.mxu1 }
 0x22d   : > { %v1340_v40 = vsub.f32 %v1287_v38, %v2324_v1  ;;  %770 = vst [vmem:[%s2485_s6 + $0x30] sm:$0xff] %v762_v21  ;;  %v698_v28 = vadd.f32 %v697_v32, %v2462_v34 }
 0x22e   : > { %v1780_v57 = vpop.eup %1779 }
 0x22f   : > { %v1348_v30 = vmul.f32 %v1772_v47, %v1340_v40  ;;  %v747_v55 = vsub.f32 %v698_v28, %v2278_v3 }
 0x231   : > { %v1356_v53 = vadd.f32 %v1348_v30, %v2324_v1  ;;  %v755_v29 = vmul.f32 %v1776_v10, %v747_v55 }
 0x232   : > { %v1289_v31 = vpop.f32.mrf.mxu3 }
 0x233   : > { %1596 = vst [vmem:[%s2485_s6 + $0x68] sm:$0xff] %v1356_v53  ;;  %v1290_v11 = vadd.f32 %v1289_v31, %v1175_v59  ;;  %v763_v56 = vadd.f32 %v755_v29, %v2278_v3 }
 0x235   : > { %v1341_v34 = vsub.f32 %v1290_v11, %v2315_v13  ;;  %771 = vst [vmem:[%s2485_s6 + $0x38] sm:$0xff] %v763_v56 }
 0x237   : > { %v1349_v61 = vmul.f32 %v1778_v43, %v1341_v34 }
 0x239   : > { %v1357_v1 = vadd.f32 %v1349_v61, %v2315_v13 }
 0x23a   : > { %v1292_v8 = vpop.f32.mrf.mxu3 }
 0x23b   : > { %1597 = vst [vmem:[%s2485_s6 + $0x70] sm:$0xff] %v1357_v1  ;;  %v1293_v3 = vadd.f32 %v1292_v8, %v1180_v52 }
 0x23d   : > { %v1342_v51 = vsub.f32 %v1293_v3, %v2305_v26 }
 0x23f   : > { %v1350_v42 = vmul.f32 %v1780_v57, %v1342_v51 }
 0x241   : > { %v1358_v37 = vadd.f32 %v1350_v42, %v2305_v26 }
 0x243   : > { %1598 = vst [vmem:[%s2485_s6 + $0x78] sm:$0xff] %v1358_v37 }
 0x244   : > { %1808 = shalt.err (!%p1805_p3)
}
 0x245   : > { %s1846_s29 = smov 128   ;;  %s1847_s30 = smov 8  }
 0x246   : > { %1608 = dma.vmem_to_hbm [thread:$0]  (%p1906_p5), %s1383_s11, 2048, %s1385_s17, %s1369_s16, %s1846_s29, %s1846_s29, %s1847_s30  }
 0x247 PF: > { %p1614_p4 = scmp.ge.s32.totalorder %s1843_s15, 2  ;;  %s1399_s4 = sand.u32 1, %s1831_s12  }
 0x248   : > { %s1400_s5 = scalar_lea.sflag [#allocation3], %s1399_s4 }
 0x249   : > { %p1611_p7 = pnand %p1614_p4, %p1910_p6 }
 0x24b   : > { %p1612_p8 = pneg %p1611_p7 }
 0x24d   : > { %1826 = dma.done.wait (%p1612_p8), %s1400_s5, 2048  }
 0x24e   : > { %1828 = vsyncadd (%p1612_p8), %s1400_s5, 4294965248  ;;  %p13_p9 = scmp.ge.s32.totalorder %s1893_s18, 4   ;;  %s2611_s12 = smov %s1835_s13 }
 0x24f   : > { %s2612_s13 = smov %s1839_s14  ;;  %s2613_s14 = smov %s1904_s21 }
 0x250   : > { %s2614_s15 = smov %s1893_s18  ;;  %15 = sbr.rel (!%p13_p9) target bundleno = 3 (0x3), region = 71 }
 0x255   :  { %1406 = vsyncpa [#allocation3], 1 }
 0x256   :  { %1408 = vsyncpa [#allocation3 + $0x1], 1 }

</bundles_post_ra>
